<compile_context>
chip_gen: v7x
topology: tpu7x:2x2x1
jax: 0.10.0
libtpu: 0.0.40
codegen_flags: <defaults>
</compile_context>

<pallas_src>
import functools

import jax
import jax.numpy as jnp
from jax.experimental import pallas as pl
from jax.experimental.pallas import tpu as pltpu

LANE = 128
SUBLANE = 8


def _round_up(n, m):
    return ((n + m - 1) // m) * m


def _vmem_limit_bytes():
    """Per-generation scoped-VMEM limit (v7x has 64 MiB physical; v5e/v6e 128 MiB)."""
    try:
        kind = jax.devices()[0].device_kind.lower()
    except Exception:
        kind = ""
    if "v7" in kind:
        return 48 * 1024 * 1024
    return 64 * 1024 * 1024


def fc_basic_kernel(x_ref,
                    w1_ref, b1_ref,
                    w2_ref, b2_ref,
                    w3_ref, b3_ref,
                    w4_ref, b4_ref,
                    w5_ref, b5_ref,
                    out_ref):
    """One batch tile through the whole 5-layer MLP (weights resident in VMEM)."""
    cdt = w1_ref.dtype  # compute dtype for MXU inputs (bf16 or f32)
    x = x_ref[...].astype(cdt)  # in-kernel cast: free VPU work hidden under MXU

    # fc1..fc4 + relu (f32 accumulate, bias add + relu in f32, recast for next dot)
    h = jnp.dot(x, w1_ref[...], preferred_element_type=jnp.float32) + b1_ref[...]
    h = jnp.maximum(h, 0.0).astype(cdt)
    h = jnp.dot(h, w2_ref[...], preferred_element_type=jnp.float32) + b2_ref[...]
    h = jnp.maximum(h, 0.0).astype(cdt)
    h = jnp.dot(h, w3_ref[...], preferred_element_type=jnp.float32) + b3_ref[...]
    h = jnp.maximum(h, 0.0).astype(cdt)
    h = jnp.dot(h, w4_ref[...], preferred_element_type=jnp.float32) + b4_ref[...]
    h = jnp.maximum(h, 0.0).astype(cdt)
    # fc5 (no activation).  Only column 0 of the 128-lane-padded result is a real
    # logit; store just that column -> 4 B/row HBM write instead of 512 B/row.
    out = jnp.dot(h, w5_ref[...], preferred_element_type=jnp.float32) + b5_ref[...]
    out_ref[...] = out[:, :1].astype(out_ref.dtype)


def init_params(key, input_size, hidden_dim):
    """Mirror FCBasicNet init: orthogonal weights, PyTorch-default uniform biases.

    Returns unpadded params: w{i}: [fan_in, fan_out] f32, b{i}: [fan_out] f32.
    """
    ortho = jax.nn.initializers.orthogonal()
    dims = [(input_size, 2 * hidden_dim),
            (2 * hidden_dim, 2 * hidden_dim),
            (2 * hidden_dim, 2 * hidden_dim),
            (2 * hidden_dim, hidden_dim),
            (hidden_dim, 1)]
    params = {}
    keys = jax.random.split(key, 2 * len(dims))
    for i, (fan_in, fan_out) in enumerate(dims):
        wk, bk = keys[2 * i], keys[2 * i + 1]
        # torch weight shape is (out, in); orthogonal_ applies to that; store transpose.
        w_torch = ortho(wk, (fan_out, fan_in), jnp.float32)
        bound = 1.0 / (fan_in ** 0.5)
        b = jax.random.uniform(bk, (fan_out,), jnp.float32, -bound, bound)
        params[f"w{i + 1}"] = w_torch.T          # [in, out]
        params[f"b{i + 1}"] = b                  # [out]
    return params


def prepare_params(params, compute_dtype=jnp.bfloat16):
    """Zero-pad hidden/output dims up to 128-lane multiples; cast weights.

    Input dim of layer 1 is left unpadded (block equals the full array dim,
    which Pallas allows); downstream dims become multiples of 128 so every
    intermediate activation is lane-dense.  Hidden dims are NOT padded beyond
    128 (no zero-FLOP inflation on the 256-wide v6e/v7x MXU).
    """
    in_dim = params["w1"].shape[0]
    out_dims = [params[f"w{i}"].shape[1] for i in range(1, 6)]
    padded_out = [_round_up(d, LANE) for d in out_dims]
    padded_in = [in_dim] + padded_out[:-1]

    prepared = {}
    for i in range(1, 6):
        w = params[f"w{i}"]
        b = params[f"b{i}"]
        ip, op = padded_in[i - 1], padded_out[i - 1]
        wp = jnp.zeros((ip, op), jnp.float32).at[: w.shape[0], : w.shape[1]].set(w)
        bp = jnp.zeros((1, op), jnp.float32).at[0, : b.shape[0]].set(b)
        prepared[f"w{i}"] = wp.astype(compute_dtype)   # MXU input dtype
        prepared[f"b{i}"] = bp                         # bias stays f32 (added post-dot)
    return prepared


@functools.partial(jax.jit, static_argnames=("tile_b", "vmem_limit"))
def _fc_basic_forward_padded(x, operands, tile_b, vmem_limit):
    Bp, in_dim = x.shape
    grid = (Bp // tile_b,)

    # Constant index maps keep the (tiny) weights/biases resident across steps.
    # NOTE: if hidden_dim / tile_b grows a lot, pipeline_mode=pl.Buffered(1) on
    # these specs would single-buffer them; not needed at this size.
    weight_specs = [pl.BlockSpec(op.shape, lambda i: (0, 0)) for op in operands]

    return pl.pallas_call(
        fc_basic_kernel,
        out_shape=jax.ShapeDtypeStruct((Bp, 1), jnp.float32),
        grid=grid,
        in_specs=[pl.BlockSpec((tile_b, in_dim), lambda i: (i, 0))] + weight_specs,
        out_specs=pl.BlockSpec((tile_b, 1), lambda i: (i, 0)),
        compiler_params=pltpu.CompilerParams(
            dimension_semantics=("parallel",),
            vmem_limit_bytes=vmem_limit,
        ),
    )(x, *operands)


def fc_basic_forward(x, prepared, *, tile_b=2048):
    """x: [B, input_size] f32 (passed through untouched; cast happens in-kernel)."""
    B, in_dim = x.shape

    # Batch tile: multiple of the f32 sublane (8), capped by the padded batch.
    tb = min(_round_up(tile_b, SUBLANE), _round_up(B, SUBLANE))
    # Keep >= 2 grid steps when the batch allows it (megacore sharding on v7x).
    half = _round_up((B + 1) // 2, SUBLANE)
    if half < tb:
        tb = half
    Bp = _round_up(B, tb)

    xp = x
    if Bp != B:
        xp = jnp.zeros((Bp, in_dim), x.dtype).at[:B].set(x)

    operands = tuple(prepared[k] for k in
                     ("w1", "b1", "w2", "b2", "w3", "b3", "w4", "b4", "w5", "b5"))

    out = _fc_basic_forward_padded(xp, operands, tb, _vmem_limit_bytes())
    # Output is already compact (Bp, 1); only trim padded batch rows if any.
    return out if Bp == B else out[:B]


def reference_forward(x, params):
    h = x
    for i in range(1, 5):
        h = jnp.maximum(jnp.dot(h, params[f"w{i}"]) + params[f"b{i}"][None, :], 0.0)
    return jnp.dot(h, params["w5"]) + params["b5"][None, :]


if __name__ == "__main__":
    input_size, hidden_dim = 16, 32   # layers: 16 -> 64 -> 64 -> 64 -> 32 -> 1
    batch = 8

    key = jax.random.PRNGKey(0)
    pkey, xkey, xkey2 = jax.random.split(key, 3)
    params = init_params(pkey, input_size, hidden_dim)
    state = jax.random.normal(xkey, (batch, input_size), jnp.float32)

    ref = reference_forward(state, params)

    # f32 compute path: exact match against the pure-JAX reference.
    prep_f32 = prepare_params(params, compute_dtype=jnp.float32)
    out_f32 = jax.block_until_ready(fc_basic_forward(state, prep_f32))
    assert out_f32.shape == (batch, 1), f"bad shape {out_f32.shape}"
    assert jnp.allclose(out_f32, ref, atol=1e-5, rtol=1e-5), "f32 mismatch vs reference"

    # bf16-input / f32-accumulate path (MXU-native on v6e/v7x): looser tolerance.
    prep_bf16 = prepare_params(params, compute_dtype=jnp.bfloat16)
    out_bf16 = jax.block_until_ready(fc_basic_forward(state, prep_bf16))
    assert jnp.allclose(out_bf16, ref, atol=1e-1, rtol=1e-1), "bf16 mismatch vs reference"

    # Multi-tile / padded-batch path (grid > 1, batch not a multiple of the tile).
    batch2 = 600
    state2 = jax.random.normal(xkey2, (batch2, input_size), jnp.float32)
    ref2 = reference_forward(state2, params)
    out2 = jax.block_until_ready(fc_basic_forward(state2, prep_f32, tile_b=256))
    assert out2.shape == (batch2, 1), f"bad shape {out2.shape}"
    assert jnp.allclose(out2, ref2, atol=1e-5, rtol=1e-5), "tiled f32 mismatch vs reference"

    print("KERNEL_OK")
</pallas_src>

<mosaic_0001>
module attributes {stable_mosaic.version = 11 : i64} {
  func.func @fc_basic_kernel(%arg0: i32, %arg1: memref<8x16xf32, #tpu.memory_space<vmem>>, %arg2: memref<16x128xf32, #tpu.memory_space<vmem>>, %arg3: memref<1x128xf32, #tpu.memory_space<vmem>>, %arg4: memref<128x128xf32, #tpu.memory_space<vmem>>, %arg5: memref<1x128xf32, #tpu.memory_space<vmem>>, %arg6: memref<128x128xf32, #tpu.memory_space<vmem>>, %arg7: memref<1x128xf32, #tpu.memory_space<vmem>>, %arg8: memref<128x128xf32, #tpu.memory_space<vmem>>, %arg9: memref<1x128xf32, #tpu.memory_space<vmem>>, %arg10: memref<128x128xf32, #tpu.memory_space<vmem>>, %arg11: memref<1x128xf32, #tpu.memory_space<vmem>>, %arg12: memref<8x1xf32, #tpu.memory_space<vmem>>) attributes {dimension_semantics = [#tpu.dimension_semantics<parallel>], iteration_bounds = array<i64: 1>, scalar_prefetch = 0 : i64, scratch_operands = 0 : i64, tpu.core_type = #tpu.core_type<tc>, window_params = [{transform_indices = @transform_0, window_bounds = array<i64: 8, 16>}, {pipeline_mode = #tpu.pipeline_mode<synchronous>, transform_indices = @transform_1, window_bounds = array<i64: 16, 128>}, {pipeline_mode = #tpu.pipeline_mode<synchronous>, transform_indices = @transform_2, window_bounds = array<i64: 1, 128>}, {pipeline_mode = #tpu.pipeline_mode<synchronous>, transform_indices = @transform_3, window_bounds = array<i64: 128, 128>}, {pipeline_mode = #tpu.pipeline_mode<synchronous>, transform_indices = @transform_4, window_bounds = array<i64: 1, 128>}, {pipeline_mode = #tpu.pipeline_mode<synchronous>, transform_indices = @transform_5, window_bounds = array<i64: 128, 128>}, {pipeline_mode = #tpu.pipeline_mode<synchronous>, transform_indices = @transform_6, window_bounds = array<i64: 1, 128>}, {pipeline_mode = #tpu.pipeline_mode<synchronous>, transform_indices = @transform_7, window_bounds = array<i64: 128, 128>}, {pipeline_mode = #tpu.pipeline_mode<synchronous>, transform_indices = @transform_8, window_bounds = array<i64: 1, 128>}, {pipeline_mode = #tpu.pipeline_mode<synchronous>, transform_indices = @transform_9, window_bounds = array<i64: 128, 128>}, {pipeline_mode = #tpu.pipeline_mode<synchronous>, transform_indices = @transform_10, window_bounds = array<i64: 1, 128>}, {transform_indices = @transform_11, window_bounds = array<i64: 8, 1>}]} {
    %c0 = arith.constant 0 : index
    %c0_0 = arith.constant 0 : index
    %0 = vector.load %arg1[%c0, %c0_0] : memref<8x16xf32, #tpu.memory_space<vmem>>, vector<8x16xf32>
    %c0_1 = arith.constant 0 : index
    %c0_2 = arith.constant 0 : index
    %1 = vector.load %arg2[%c0_1, %c0_2] : memref<16x128xf32, #tpu.memory_space<vmem>>, vector<16x128xf32>
    %cst = arith.constant dense<0.000000e+00> : vector<8x128xf32>
    %2 = tpu.matmul %0, %1, %cst {dimension_numbers = #tpu.dot_dimension_numbers<[1], [0], [0], [1], [0, 0, 1, 1], [], []>} : vector<8x16xf32>, vector<16x128xf32>, vector<8x128xf32> -> vector<8x128xf32>
    %c0_3 = arith.constant 0 : index
    %c0_4 = arith.constant 0 : index
    %3 = vector.load %arg3[%c0_3, %c0_4] : memref<1x128xf32, #tpu.memory_space<vmem>>, vector<1x128xf32>
    %4 = vector.broadcast %3 : vector<1x128xf32> to vector<8x128xf32>
    %5 = arith.addf %2, %4 : vector<8x128xf32>
    %cst_5 = arith.constant 0.000000e+00 : f32
    %6 = vector.broadcast %cst_5 : f32 to vector<8x128xf32>
    %7 = arith.maximumf %5, %6 : vector<8x128xf32>
    %c0_6 = arith.constant 0 : index
    %c0_7 = arith.constant 0 : index
    %8 = vector.load %arg4[%c0_6, %c0_7] : memref<128x128xf32, #tpu.memory_space<vmem>>, vector<128x128xf32>
    %cst_8 = arith.constant dense<0.000000e+00> : vector<8x128xf32>
    %9 = tpu.matmul %7, %8, %cst_8 {dimension_numbers = #tpu.dot_dimension_numbers<[1], [0], [0], [1], [0, 0, 1, 1], [], []>} : vector<8x128xf32>, vector<128x128xf32>, vector<8x128xf32> -> vector<8x128xf32>
    %c0_9 = arith.constant 0 : index
    %c0_10 = arith.constant 0 : index
    %10 = vector.load %arg5[%c0_9, %c0_10] : memref<1x128xf32, #tpu.memory_space<vmem>>, vector<1x128xf32>
    %11 = vector.broadcast %10 : vector<1x128xf32> to vector<8x128xf32>
    %12 = arith.addf %9, %11 : vector<8x128xf32>
    %cst_11 = arith.constant 0.000000e+00 : f32
    %13 = vector.broadcast %cst_11 : f32 to vector<8x128xf32>
    %14 = arith.maximumf %12, %13 : vector<8x128xf32>
    %c0_12 = arith.constant 0 : index
    %c0_13 = arith.constant 0 : index
    %15 = vector.load %arg6[%c0_12, %c0_13] : memref<128x128xf32, #tpu.memory_space<vmem>>, vector<128x128xf32>
    %cst_14 = arith.constant dense<0.000000e+00> : vector<8x128xf32>
    %16 = tpu.matmul %14, %15, %cst_14 {dimension_numbers = #tpu.dot_dimension_numbers<[1], [0], [0], [1], [0, 0, 1, 1], [], []>} : vector<8x128xf32>, vector<128x128xf32>, vector<8x128xf32> -> vector<8x128xf32>
    %c0_15 = arith.constant 0 : index
    %c0_16 = arith.constant 0 : index
    %17 = vector.load %arg7[%c0_15, %c0_16] : memref<1x128xf32, #tpu.memory_space<vmem>>, vector<1x128xf32>
    %18 = vector.broadcast %17 : vector<1x128xf32> to vector<8x128xf32>
    %19 = arith.addf %16, %18 : vector<8x128xf32>
    %cst_17 = arith.constant 0.000000e+00 : f32
    %20 = vector.broadcast %cst_17 : f32 to vector<8x128xf32>
    %21 = arith.maximumf %19, %20 : vector<8x128xf32>
    %c0_18 = arith.constant 0 : index
    %c0_19 = arith.constant 0 : index
    %22 = vector.load %arg8[%c0_18, %c0_19] : memref<128x128xf32, #tpu.memory_space<vmem>>, vector<128x128xf32>
    %cst_20 = arith.constant dense<0.000000e+00> : vector<8x128xf32>
    %23 = tpu.matmul %21, %22, %cst_20 {dimension_numbers = #tpu.dot_dimension_numbers<[1], [0], [0], [1], [0, 0, 1, 1], [], []>} : vector<8x128xf32>, vector<128x128xf32>, vector<8x128xf32> -> vector<8x128xf32>
    %c0_21 = arith.constant 0 : index
    %c0_22 = arith.constant 0 : index
    %24 = vector.load %arg9[%c0_21, %c0_22] : memref<1x128xf32, #tpu.memory_space<vmem>>, vector<1x128xf32>
    %25 = vector.broadcast %24 : vector<1x128xf32> to vector<8x128xf32>
    %26 = arith.addf %23, %25 : vector<8x128xf32>
    %cst_23 = arith.constant 0.000000e+00 : f32
    %27 = vector.broadcast %cst_23 : f32 to vector<8x128xf32>
    %28 = arith.maximumf %26, %27 : vector<8x128xf32>
    %c0_24 = arith.constant 0 : index
    %c0_25 = arith.constant 0 : index
    %29 = vector.load %arg10[%c0_24, %c0_25] : memref<128x128xf32, #tpu.memory_space<vmem>>, vector<128x128xf32>
    %cst_26 = arith.constant dense<0.000000e+00> : vector<8x128xf32>
    %30 = tpu.matmul %28, %29, %cst_26 {dimension_numbers = #tpu.dot_dimension_numbers<[1], [0], [0], [1], [0, 0, 1, 1], [], []>} : vector<8x128xf32>, vector<128x128xf32>, vector<8x128xf32> -> vector<8x128xf32>
    %c0_27 = arith.constant 0 : index
    %c0_28 = arith.constant 0 : index
    %31 = vector.load %arg11[%c0_27, %c0_28] : memref<1x128xf32, #tpu.memory_space<vmem>>, vector<1x128xf32>
    %32 = vector.broadcast %31 : vector<1x128xf32> to vector<8x128xf32>
    %33 = arith.addf %30, %32 : vector<8x128xf32>
    %34 = vector.extract_strided_slice %33 {offsets = [0, 0], sizes = [8, 1], strides = [1, 1]} : vector<8x128xf32> to vector<8x1xf32>
    %c0_29 = arith.constant 0 : index
    %c0_30 = arith.constant 0 : index
    %35 = vector.load %arg12[%c0_29, %c0_30] : memref<8x1xf32, #tpu.memory_space<vmem>>, vector<8x1xf32>
    tpu.vector_store %arg12[%c0_29, %c0_30], %34 {strides = array<i32>} : memref<8x1xf32, #tpu.memory_space<vmem>>, vector<8x1xf32>,
    return
  }
  func.func @transform_0(%arg0: i32) -> (i32, i32) {
    %c0_i32 = arith.constant 0 : i32
    %c0_i32_0 = arith.constant 0 : i32
    return %arg0, %c0_i32 : i32, i32
  }
  func.func @transform_1(%arg0: i32) -> (i32, i32) {
    %c0_i32 = arith.constant 0 : i32
    %c0_i32_0 = arith.constant 0 : i32
    %c0_i32_1 = arith.constant 0 : i32
    return %c0_i32, %c0_i32_0 : i32, i32
  }
  func.func @transform_2(%arg0: i32) -> (i32, i32) {
    %c0_i32 = arith.constant 0 : i32
    %c0_i32_0 = arith.constant 0 : i32
    %c0_i32_1 = arith.constant 0 : i32
    return %c0_i32, %c0_i32_0 : i32, i32
  }
  func.func @transform_3(%arg0: i32) -> (i32, i32) {
    %c0_i32 = arith.constant 0 : i32
    %c0_i32_0 = arith.constant 0 : i32
    %c0_i32_1 = arith.constant 0 : i32
    return %c0_i32, %c0_i32_0 : i32, i32
  }
  func.func @transform_4(%arg0: i32) -> (i32, i32) {
    %c0_i32 = arith.constant 0 : i32
    %c0_i32_0 = arith.constant 0 : i32
    %c0_i32_1 = arith.constant 0 : i32
    return %c0_i32, %c0_i32_0 : i32, i32
  }
  func.func @transform_5(%arg0: i32) -> (i32, i32) {
    %c0_i32 = arith.constant 0 : i32
    %c0_i32_0 = arith.constant 0 : i32
    %c0_i32_1 = arith.constant 0 : i32
    return %c0_i32, %c0_i32_0 : i32, i32
  }
  func.func @transform_6(%arg0: i32) -> (i32, i32) {
    %c0_i32 = arith.constant 0 : i32
    %c0_i32_0 = arith.constant 0 : i32
    %c0_i32_1 = arith.constant 0 : i32
    return %c0_i32, %c0_i32_0 : i32, i32
  }
  func.func @transform_7(%arg0: i32) -> (i32, i32) {
    %c0_i32 = arith.constant 0 : i32
    %c0_i32_0 = arith.constant 0 : i32
    %c0_i32_1 = arith.constant 0 : i32
    return %c0_i32, %c0_i32_0 : i32, i32
  }
  func.func @transform_8(%arg0: i32) -> (i32, i32) {
    %c0_i32 = arith.constant 0 : i32
    %c0_i32_0 = arith.constant 0 : i32
    %c0_i32_1 = arith.constant 0 : i32
    return %c0_i32, %c0_i32_0 : i32, i32
  }
  func.func @transform_9(%arg0: i32) -> (i32, i32) {
    %c0_i32 = arith.constant 0 : i32
    %c0_i32_0 = arith.constant 0 : i32
    %c0_i32_1 = arith.constant 0 : i32
    return %c0_i32, %c0_i32_0 : i32, i32
  }
  func.func @transform_10(%arg0: i32) -> (i32, i32) {
    %c0_i32 = arith.constant 0 : i32
    %c0_i32_0 = arith.constant 0 : i32
    %c0_i32_1 = arith.constant 0 : i32
    return %c0_i32, %c0_i32_0 : i32, i32
  }
  func.func @transform_11(%arg0: i32) -> (i32, i32) {
    %c0_i32 = arith.constant 0 : i32
    %c0_i32_0 = arith.constant 0 : i32
    return %arg0, %c0_i32 : i32, i32
  }
}

</mosaic_0001>

<bundles_post_ra>
// kernel: _fc_basic_forward_padded.1
= control target key start
LH: loop header
LB: loop body
LE: loop exit
PB: predicated region body
PF: predicated region fallthrough
CT: control target
= control target key end

     0   :  { %16 = vsyncpa [#allocation3], 0  ;;  %s1555_s0 = inlined_call_operand.hbm [shape: f32[8,16], index: 0, kind: input, shape index: {}]   ;;  %s1556_s1 = inlined_call_operand.hbm [shape: f32[16,128], index: 1, kind: input, shape index: {}]   ;;  %s1557_s2 = inlined_call_operand.hbm [shape: f32[1,128], index: 2, kind: input, shape index: {}]   ;;  %s1558_s3 = inlined_call_operand.hbm [shape: f32[128,128], index: 3, kind: input, shape index: {}]   ;;  %s1559_s4 = inlined_call_operand.hbm [shape: f32[1,128], index: 4, kind: input, shape index: {}]   ;;  %s1560_s5 = inlined_call_operand.hbm [shape: f32[128,128], index: 5, kind: input, shape index: {}]   ;;  %s1561_s6 = inlined_call_operand.hbm [shape: f32[1,128], index: 6, kind: input, shape index: {}]   ;;  %s1562_s7 = inlined_call_operand.hbm [shape: f32[128,128], index: 7, kind: input, shape index: {}]   ;;  %s1563_s8 = inlined_call_operand.hbm [shape: f32[1,128], index: 8, kind: input, shape index: {}]   ;;  %s1564_s9 = inlined_call_operand.hbm [shape: f32[128,128], index: 9, kind: input, shape index: {}]   ;;  %s1565_s10 = inlined_call_operand.hbm [shape: f32[1,128], index: 10, kind: input, shape index: {}]   ;;  %s1566_s11 = inlined_call_operand.hbm [shape: f32[8,1], index: 11, kind: output, shape index: {}]  }
   0x1   :  { %17 = vsyncpa [#allocation6], 0 }
   0x2   :  { %18 = vsyncpa [#allocation9], 0 }
   0x3   :  { %19 = vsyncpa [#allocation12], 0 }
   0x4   :  { %20 = vsyncpa [#allocation15], 0 }
   0x5   :  { %21 = vsyncpa [#allocation18], 0 }
   0x6   :  { %22 = vsyncpa [#allocation4], 0  ;;  %s1276_s17 = smov [#allocation5]   ;;  %s998_s21 = scalar_lea.hbm %s1556_s1, 256 }
   0x7   :  { %s38_s18 = sshll.u32 %s1276_s17, 4  ;;  %p999_p0 = scmp.ne.s32.totalorder %s1556_s1, %s998_s21  ;;  %s39_s18 = int_to_ptr.vmem [resolvable:$true] %s38_s18 }
   0x8   :  { %p1002_p1 = scmp.lt.u32.totalorder %s998_s21, %s1556_s1 }
   0xa   :  { %p1004_p2 = pnand %p1002_p1, %p999_p0 }
   0xc   :  { %1007 = shalt.err (!%p1004_p2)
}
   0xd   :  { %s1008_s26 = scalar_lea.vmem %s39_s18, 256  ;;  %p1013_p4 = scmp.lt.s32.totalorder %s39_s18, %s39_s18 }
   0xe   :  { %p1009_p3 = scmp.ne.s32.totalorder %s39_s18, %s1008_s26  ;;  %p1014_p5 = scmp.lt.s32.totalorder %s1008_s26, %s1008_s26 }
  0x10   :  { %p1015_p6 = por %p1014_p5, %p1013_p4 }
  0x12   :  { %p1016_p7 = pnand %p1015_p6, %p1009_p3 }
  0x14   :  { %1019 = shalt.err (!%p1016_p7)
}
  0x15   :  { %s1277_s27 = smov 128   ;;  %s1278_s28 = smov 8  }
  0x16   :  { %44 = dma.hbm_to_vmem [thread:$0]  %s1556_s1, 256, %s39_s18, [#allocation6], %s1277_s27, %s1277_s27, %s1278_s28  }
  0x17   :  { %s1279_s12 = smov [#allocation8]   ;;  %s1280_s14 = smov [#allocation11]  }
  0x18   :  { %s60_s13 = sshll.u32 %s1279_s12, 4  ;;  %s82_s15 = sshll.u32 %s1280_s14, 4  ;;  %s61_s13 = int_to_ptr.vmem [resolvable:$true] %s60_s13  ;;  %s83_s15 = int_to_ptr.vmem [resolvable:$true] %s82_s15 }
  0x19   :  { %s1020_s19 = scalar_lea.hbm %s1558_s3, 2048 }
  0x1a   :  { %p1021_p8 = scmp.ne.s32.totalorder %s1558_s3, %s1020_s19  ;;  %p1024_p9 = scmp.lt.u32.totalorder %s1020_s19, %s1558_s3 }
  0x1c   :  { %p1026_p10 = pnand %p1024_p9, %p1021_p8 }
  0x1e   :  { %1029 = shalt.err (!%p1026_p10)
}
  0x1f   :  { %s1030_s1 = scalar_lea.vmem %s61_s13, 2048  ;;  %p1035_p12 = scmp.lt.s32.totalorder %s61_s13, %s61_s13 }
  0x20   :  { %p1031_p11 = scmp.ne.s32.totalorder %s61_s13, %s1030_s1  ;;  %p1036_p13 = scmp.lt.s32.totalorder %s1030_s1, %s1030_s1 }
  0x22   :  { %p1037_p0 = por %p1036_p13, %p1035_p12 }
  0x24   :  { %p1038_p1 = pnand %p1037_p0, %p1031_p11 }
  0x26   :  { %1041 = shalt.err (!%p1038_p1)
}
  0x27   :  { %66 = dma.hbm_to_vmem [thread:$0]  %s1558_s3, 2048, %s61_s13, [#allocation9], %s1277_s27, %s1277_s27, %s1278_s28  }
  0x28   :  { %s1042_s29 = scalar_lea.hbm %s1560_s5, 2048 }
  0x29   :  { %p1043_p2 = scmp.ne.s32.totalorder %s1560_s5, %s1042_s29  ;;  %p1046_p3 = scmp.lt.u32.totalorder %s1042_s29, %s1560_s5 }
  0x2b   :  { %p1048_p4 = pnand %p1046_p3, %p1043_p2 }
  0x2d   :  { %1051 = shalt.err (!%p1048_p4)
}
  0x2e   :  { %s1052_s17 = scalar_lea.vmem %s83_s15, 2048  ;;  %p1057_p6 = scmp.lt.s32.totalorder %s83_s15, %s83_s15 }
  0x2f   :  { %p1053_p5 = scmp.ne.s32.totalorder %s83_s15, %s1052_s17  ;;  %p1058_p7 = scmp.lt.s32.totalorder %s1052_s17, %s1052_s17 }
  0x31   :  { %p1059_p8 = por %p1058_p7, %p1057_p6 }
  0x33   :  { %p1060_p9 = pnand %p1059_p8, %p1053_p5 }
  0x35   :  { %1063 = shalt.err (!%p1060_p9)
}
  0x36   :  { %88 = dma.hbm_to_vmem [thread:$0]  %s1560_s5, 2048, %s83_s15, [#allocation12], %s1277_s27, %s1277_s27, %s1278_s28  }
  0x37   :  { %s1281_s19 = smov [#allocation14]   ;;  %s1282_s21 = smov [#allocation17]  }
  0x38   :  { %s104_s20 = sshll.u32 %s1281_s19, 4  ;;  %s126_s22 = sshll.u32 %s1282_s21, 4  ;;  %s105_s20 = int_to_ptr.vmem [resolvable:$true] %s104_s20  ;;  %s127_s22 = int_to_ptr.vmem [resolvable:$true] %s126_s22 }
  0x39   :  { %s1064_s18 = scalar_lea.hbm %s1562_s7, 2048 }
  0x3a   :  { %p1065_p10 = scmp.ne.s32.totalorder %s1562_s7, %s1064_s18  ;;  %p1068_p11 = scmp.lt.u32.totalorder %s1064_s18, %s1562_s7 }
  0x3c   :  { %p1070_p12 = pnand %p1068_p11, %p1065_p10 }
  0x3e   :  { %1073 = shalt.err (!%p1070_p12)
}
  0x3f   :  { %s1074_s5 = scalar_lea.vmem %s105_s20, 2048  ;;  %p1079_p0 = scmp.lt.s32.totalorder %s105_s20, %s105_s20 }
  0x40   :  { %p1075_p13 = scmp.ne.s32.totalorder %s105_s20, %s1074_s5  ;;  %p1080_p1 = scmp.lt.s32.totalorder %s1074_s5, %s1074_s5 }
  0x42   :  { %p1081_p2 = por %p1080_p1, %p1079_p0 }
  0x44   :  { %p1082_p3 = pnand %p1081_p2, %p1075_p13 }
  0x46   :  { %1085 = shalt.err (!%p1082_p3)
}
  0x47   :  { %110 = dma.hbm_to_vmem [thread:$0]  %s1562_s7, 2048, %s105_s20, [#allocation15], %s1277_s27, %s1277_s27, %s1278_s28  }
  0x48   :  { %s1086_s16 = scalar_lea.hbm %s1564_s9, 2048 }
  0x49   :  { %p1087_p4 = scmp.ne.s32.totalorder %s1564_s9, %s1086_s16  ;;  %p1090_p5 = scmp.lt.u32.totalorder %s1086_s16, %s1564_s9 }
  0x4b   :  { %p1092_p6 = pnand %p1090_p5, %p1087_p4 }
  0x4d   :  { %1095 = shalt.err (!%p1092_p6)
}
  0x4e   :  { %s1096_s21 = scalar_lea.vmem %s127_s22, 2048  ;;  %p1101_p8 = scmp.lt.s32.totalorder %s127_s22, %s127_s22 }
  0x4f   :  { %p1097_p7 = scmp.ne.s32.totalorder %s127_s22, %s1096_s21  ;;  %p1102_p9 = scmp.lt.s32.totalorder %s1096_s21, %s1096_s21 }
  0x51   :  { %p1103_p10 = por %p1102_p9, %p1101_p8 }
  0x53   :  { %p1104_p11 = pnand %p1103_p10, %p1097_p7 }
  0x55   :  { %1107 = shalt.err (!%p1104_p11)
}
  0x56   :  { %132 = dma.hbm_to_vmem [thread:$0]  %s1564_s9, 2048, %s127_s22, [#allocation18], %s1277_s27, %s1277_s27, %s1278_s28  }
  0x57   :  { %s1283_s23 = smov [#allocation2]   ;;  %s1284_s18 = smov [#allocation7]  }
  0x58   :  { %s29_s1 = sshll.u32 %s1283_s23, 4  ;;  %s51_s24 = sshll.u32 %s1284_s18, 4  ;;  %s30_s1 = int_to_ptr.vmem [resolvable:$true] %s29_s1  ;;  %s52_s24 = int_to_ptr.vmem [resolvable:$true] %s51_s24 }
  0x59   :  { %s1108_s29 = scalar_lea.hbm %s1555_s0, 128 }
  0x5a   :  { %p1109_p12 = scmp.ne.s32.totalorder %s1555_s0, %s1108_s29  ;;  %p1112_p13 = scmp.lt.u32.totalorder %s1108_s29, %s1555_s0 }
  0x5c   :  { %p1114_p0 = pnand %p1112_p13, %p1109_p12 }
  0x5e   :  { %1117 = shalt.err (!%p1114_p0)
}
  0x5f   :  { %s1118_s9 = scalar_lea.vmem %s30_s1, 128  ;;  %p1123_p2 = scmp.lt.s32.totalorder %s30_s1, %s30_s1 }
  0x60   :  { %p1119_p1 = scmp.ne.s32.totalorder %s30_s1, %s1118_s9  ;;  %p1124_p3 = scmp.lt.s32.totalorder %s1118_s9, %s1118_s9 }
  0x62   :  { %p1125_p4 = por %p1124_p3, %p1123_p2 }
  0x64   :  { %p1126_p5 = pnand %p1125_p4, %p1119_p1 }
  0x66   :  { %1129 = shalt.err (!%p1126_p5)
}
  0x67   :  { %32 = dma.hbm_to_vmem [thread:$0]  %s1555_s0, 128, %s30_s1, [#allocation3]  }
  0x68   :  { %s1130_s16 = scalar_lea.hbm %s1557_s2, 16 }
  0x69   :  { %p1131_p6 = scmp.ne.s32.totalorder %s1557_s2, %s1130_s16  ;;  %p1134_p7 = scmp.lt.u32.totalorder %s1130_s16, %s1557_s2 }
  0x6b   :  { %p1136_p8 = pnand %p1134_p7, %p1131_p6 }
  0x6d   :  { %1139 = shalt.err (!%p1136_p8)
}
  0x6e   :  { %s1140_s21 = scalar_lea.vmem %s52_s24, 16  ;;  %s1144_s7 = scalar_lea.vmem %s52_s24, 32 }
  0x6f   :  { %p1141_p9 = scmp.ne.s32.totalorder %s52_s24, %s1140_s21  ;;  %p1145_p10 = scmp.lt.s32.totalorder %s52_s24, %s52_s24 }
  0x70   :  { %p1146_p11 = scmp.lt.s32.totalorder %s1144_s7, %s1140_s21 }
  0x72   :  { %p1147_p12 = por %p1146_p11, %p1145_p10 }
  0x74   :  { %p1148_p13 = pnand %p1147_p12, %p1141_p9 }
  0x76   :  { %1151 = shalt.err (!%p1148_p13)
}
  0x77   :  { %54 = dma.hbm_to_vmem [thread:$0]  %s1557_s2, 16, %s52_s24, [#allocation6]  }
  0x78   :  { %s1285_s23 = smov [#allocation10]   ;;  %s1286_s18 = smov [#allocation13]  }
  0x79   :  { %s73_s1 = sshll.u32 %s1285_s23, 4  ;;  %s95_s25 = sshll.u32 %s1286_s18, 4  ;;  %s74_s1 = int_to_ptr.vmem [resolvable:$true] %s73_s1  ;;  %s96_s25 = int_to_ptr.vmem [resolvable:$true] %s95_s25 }
  0x7a   :  { %s1152_s5 = scalar_lea.hbm %s1559_s4, 16 }
  0x7b   :  { %p1153_p0 = scmp.ne.s32.totalorder %s1559_s4, %s1152_s5  ;;  %p1156_p1 = scmp.lt.u32.totalorder %s1152_s5, %s1559_s4 }
  0x7d   :  { %p1158_p2 = pnand %p1156_p1, %p1153_p0 }
  0x7f   :  { %1161 = shalt.err (!%p1158_p2)
}
  0x80   :  { %s1162_s2 = scalar_lea.vmem %s74_s1, 16  ;;  %s1166_s24 = scalar_lea.vmem %s74_s1, 32 }
  0x81   :  { %p1163_p3 = scmp.ne.s32.totalorder %s74_s1, %s1162_s2  ;;  %p1167_p4 = scmp.lt.s32.totalorder %s74_s1, %s74_s1 }
  0x82   :  { %p1168_p5 = scmp.lt.s32.totalorder %s1166_s24, %s1162_s2 }
  0x84   :  { %p1169_p6 = por %p1168_p5, %p1167_p4 }
  0x86   :  { %p1170_p7 = pnand %p1169_p6, %p1163_p3 }
  0x88   :  { %1173 = shalt.err (!%p1170_p7)
}
  0x89   :  { %76 = dma.hbm_to_vmem [thread:$0]  %s1559_s4, 16, %s74_s1, [#allocation9]  }
  0x8a   :  { %s1174_s16 = scalar_lea.hbm %s1561_s6, 16 }
  0x8b   :  { %p1175_p8 = scmp.ne.s32.totalorder %s1561_s6, %s1174_s16  ;;  %p1178_p9 = scmp.lt.u32.totalorder %s1174_s16, %s1561_s6 }
  0x8d   :  { %p1180_p10 = pnand %p1178_p9, %p1175_p8 }
  0x8f   :  { %1183 = shalt.err (!%p1180_p10)
}
  0x90   :  { %s1184_s21 = scalar_lea.vmem %s96_s25, 16  ;;  %s1188_s7 = scalar_lea.vmem %s96_s25, 32 }
  0x91   :  { %p1185_p11 = scmp.ne.s32.totalorder %s96_s25, %s1184_s21  ;;  %p1189_p12 = scmp.lt.s32.totalorder %s96_s25, %s96_s25 }
  0x92   :  { %p1190_p13 = scmp.lt.s32.totalorder %s1188_s7, %s1184_s21 }
  0x94   :  { %p1191_p0 = por %p1190_p13, %p1189_p12 }
  0x96   :  { %p1192_p1 = pnand %p1191_p0, %p1185_p11 }
  0x98   :  { %1195 = shalt.err (!%p1192_p1)
}
  0x99   :  { %98 = dma.hbm_to_vmem [thread:$0]  %s1561_s6, 16, %s96_s25, [#allocation12]  }
  0x9a   :  { %s1287_s20 = smov [#allocation16]   ;;  %s1288_s1 = smov [#allocation19]  }
  0x9b   :  { %s117_s23 = sshll.u32 %s1287_s20, 4  ;;  %s139_s18 = sshll.u32 %s1288_s1, 4  ;;  %s118_s23 = int_to_ptr.vmem [resolvable:$true] %s117_s23  ;;  %s140_s18 = int_to_ptr.vmem [resolvable:$true] %s139_s18 }
  0x9c   :  { %s1196_s5 = scalar_lea.hbm %s1563_s8, 16 }
  0x9d   :  { %p1197_p2 = scmp.ne.s32.totalorder %s1563_s8, %s1196_s5  ;;  %p1200_p3 = scmp.lt.u32.totalorder %s1196_s5, %s1563_s8 }
  0x9f   :  { %p1202_p4 = pnand %p1200_p3, %p1197_p2 }
  0xa1   :  { %1205 = shalt.err (!%p1202_p4)
}
  0xa2   :  { %s1206_s6 = scalar_lea.vmem %s118_s23, 16  ;;  %s1210_s25 = scalar_lea.vmem %s118_s23, 32 }
  0xa3   :  { %p1207_p5 = scmp.ne.s32.totalorder %s118_s23, %s1206_s6  ;;  %p1211_p6 = scmp.lt.s32.totalorder %s118_s23, %s118_s23 }
  0xa4   :  { %p1212_p7 = scmp.lt.s32.totalorder %s1210_s25, %s1206_s6 }
  0xa6   :  { %p1213_p8 = por %p1212_p7, %p1211_p6 }
  0xa8   :  { %p1214_p9 = pnand %p1213_p8, %p1207_p5 }
  0xaa   :  { %1217 = shalt.err (!%p1214_p9)
}
  0xab   :  { %120 = dma.hbm_to_vmem [thread:$0]  %s1563_s8, 16, %s118_s23, [#allocation15]  }
  0xac   :  { %s1218_s22 = scalar_lea.hbm %s1565_s10, 16 }
  0xad   :  { %p1219_p10 = scmp.ne.s32.totalorder %s1565_s10, %s1218_s22  ;;  %p1222_p11 = scmp.lt.u32.totalorder %s1218_s22, %s1565_s10 }
  0xaf   :  { %p1224_p12 = pnand %p1222_p11, %p1219_p10 }
  0xb1   :  { %1227 = shalt.err (!%p1224_p12)
}
  0xb2   :  { %s1228_s13 = scalar_lea.vmem %s140_s18, 16  ;;  %s1232_s19 = scalar_lea.vmem %s140_s18, 32 }
  0xb3   :  { %p1229_p13 = scmp.ne.s32.totalorder %s140_s18, %s1228_s13  ;;  %p1233_p0 = scmp.lt.s32.totalorder %s140_s18, %s140_s18 }
  0xb4   :  { %p1234_p1 = scmp.lt.s32.totalorder %s1232_s19, %s1228_s13 }
  0xb6   :  { %p1235_p2 = por %p1234_p1, %p1233_p0 }
  0xb8   :  { %p1236_p3 = pnand %p1235_p2, %p1229_p13 }
  0xba   :  { %1239 = shalt.err (!%p1236_p3)
}
  0xbb   :  { %142 = dma.hbm_to_vmem [thread:$0]  %s1565_s10, 16, %s140_s18, [#allocation18]  }
  0xbc   :  { %1262 = dma.done.wait [#allocation3], 128  }
  0xbd   :  { %1263 = vsyncadd [#allocation3], 4294967168 }
  0xbe   :  { %1264 = dma.done.wait [#allocation6], 272  }
  0xbf   :  { %1265 = vsyncadd [#allocation6], 4294967024 }
  0xc0   :  { %1266 = dma.done.wait [#allocation9], 2064  }
  0xc1   :  { %1267 = vsyncadd [#allocation9], 4294965232 }
  0xc2   :  { %1268 = dma.done.wait [#allocation12], 2064  }
  0xc3   :  { %1269 = vsyncadd [#allocation12], 4294965232 }
  0xc4   :  { %1270 = dma.done.wait [#allocation15], 2064  }
  0xc5   :  { %1271 = vsyncadd [#allocation15], 4294965232 }
  0xc6   :  { %1272 = dma.done.wait [#allocation18], 2064  }
  0xc7   :  { %1273 = vsyncadd [#allocation18], 4294965232  ;;  %v1289_v0 = vmov 0.0|0.0   ;;  %vm1290_vm0 = vmmov 0   ;;  %v1291_v1 = vmov 0.0   ;;  %v177_v2 = vld [vmem:[#allocation5] sm:$0xff] }
  0xc8   :  { %882 = vmatprep.subr.bf16.mxu0 %v1289_v0  ;;  %739 = vmatprep.mubr.msk.f32.mxu0 %vm1290_vm0, %v1291_v1  ;;  %v178_v3 = vld [vmem:[#allocation5 + $0x8] sm:$0xff]  ;;  %v261_v5 = vld [vmem:[#allocation8] sm:$0xff]  ;;  %v262_v6 = vld [vmem:[#allocation8 + $0x8] sm:$0xff]  ;;  %vm186_vm1 = vcmask 130048   ;;  %s1292_s10 = smov [#allocation20]   ;;  %vm636_vm2 = vcmask 7168  }
  0xc9   :  { %885 = vmatprep.subr.bf16.mxu1 %v1289_v0  ;;  %774 = vmatprep.mubr.msk.f32.mxu1 %vm1290_vm0, %v1291_v1  ;;  %v883_v4 = vpack.c.bf16 %v178_v3, %v177_v2  ;;  %v263_v7 = vld [vmem:[#allocation8 + $0x10] sm:$0xff]  ;;  %v886_v8 = vpack.c.bf16 %v262_v6, %v261_v5  ;;  %v264_v9 = vld [vmem:[#allocation8 + $0x18] sm:$0xff]  ;;  %v176_v10 = vld [vmem:[#allocation2] sm:$0xff]  ;;  %s644_s7 = sshll.u32 %s1292_s10, 4  ;;  %s645_s7 = int_to_ptr.vmem [resolvable:$true] %s644_s7 }
  0xca   :  { %v889_v11 = vpack.c.bf16 %v264_v9, %v263_v7  ;;  %v265_v12 = vld [vmem:[#allocation8 + $0x20] sm:$0xff]  ;;  %v266_v13 = vld [vmem:[#allocation8 + $0x28] sm:$0xff]  ;;  %v267_v15 = vld [vmem:[#allocation8 + $0x30] sm:$0xff]  ;;  %s1240_s4 = scalar_lea.vmem %s645_s7, 128  ;;  %p1245_p5 = scmp.lt.s32.totalorder %s645_s7, %s645_s7 }
  0xcb   :  { %884 = vmatpush3.bf16.msra.mxu0 %v883_v4  ;;  %887 = vmatpush3.bf16.msra.mxu1 %v886_v8  ;;  %v892_v14 = vpack.c.bf16 %v266_v13, %v265_v12  ;;  %v268_v16 = vld [vmem:[#allocation8 + $0x38] sm:$0xff]  ;;  %v269_v18 = vld [vmem:[#allocation8 + $0x40] sm:$0xff]  ;;  %v270_v19 = vld [vmem:[#allocation8 + $0x48] sm:$0xff]  ;;  %p1241_p4 = scmp.ne.s32.totalorder %s645_s7, %s1240_s4  ;;  %p1246_p6 = scmp.lt.s32.totalorder %s1240_s4, %s1240_s4 }
  0xcc   :  { %909 = vmatprep.subr.bf16.mxu0 %v1289_v0  ;;  %888 = vmatprep.subr.bf16.mxu1 %v1289_v0  ;;  %v895_v17 = vpack.c.bf16 %v268_v16, %v267_v15  ;;  %v898_v20 = vpack.c.bf16 %v270_v19, %v269_v18  ;;  %v271_v21 = vld [vmem:[#allocation8 + $0x50] sm:$0xff]  ;;  %v272_v22 = vld [vmem:[#allocation8 + $0x58] sm:$0xff]  ;;  %v273_v24 = vld [vmem:[#allocation8 + $0x60] sm:$0xff] }
  0xcd   :  { %v901_v23 = vpack.c.bf16 %v272_v22, %v271_v21  ;;  %v274_v25 = vld [vmem:[#allocation8 + $0x68] sm:$0xff]  ;;  %v275_v27 = vld [vmem:[#allocation8 + $0x70] sm:$0xff]  ;;  %v276_v28 = vld [vmem:[#allocation8 + $0x78] sm:$0xff]  ;;  %p1247_p7 = por %p1246_p6, %p1245_p5 }
  0xce   :  { %740 = vmatmul.mubr.msk.f32.vlgmr.msra.gmra.mrb[0].mxu0 %vm186_vm1, %v176_v10  ;;  %v904_v26 = vpack.c.bf16 %v274_v25, %v273_v24  ;;  %v907_v29 = vpack.c.bf16 %v276_v28, %v275_v27  ;;  %v355_v30 = vld [vmem:[#allocation11] sm:$0xff]  ;;  %v356_v31 = vld [vmem:[#allocation11 + $0x8] sm:$0xff]  ;;  %v357_v32 = vld [vmem:[#allocation11 + $0x10] sm:$0xff] }
  0xcf   :  { %809 = vmatprep.mubr.msk.f32.mxu0 %vm1290_vm0, %v1291_v1  ;;  %890 = vmatpush3.bf16.msra.mxu1 %v889_v11  ;;  %v910_v33 = vpack.c.bf16 %v356_v31, %v355_v30  ;;  %v358_v34 = vld [vmem:[#allocation11 + $0x18] sm:$0xff]  ;;  %v359_v36 = vld [vmem:[#allocation11 + $0x20] sm:$0xff]  ;;  %v360_v37 = vld [vmem:[#allocation11 + $0x28] sm:$0xff]  ;;  %p1248_p8 = pnand %p1247_p7, %p1241_p4 }
  0xd0   :  { %891 = vmatprep.subr.bf16.mxu1 %v1289_v0  ;;  %v913_v35 = vpack.c.bf16 %v358_v34, %v357_v32  ;;  %v916_v38 = vpack.c.bf16 %v360_v37, %v359_v36  ;;  %v361_v39 = vld [vmem:[#allocation11 + $0x30] sm:$0xff]  ;;  %v362_v40 = vld [vmem:[#allocation11 + $0x38] sm:$0xff]  ;;  %v363_v42 = vld [vmem:[#allocation11 + $0x40] sm:$0xff] }
  0xd1   :  { %911 = vmatpush3.bf16.msra.mxu0 %v910_v33  ;;  %v919_v41 = vpack.c.bf16 %v362_v40, %v361_v39  ;;  %v364_v43 = vld [vmem:[#allocation11 + $0x48] sm:$0xff]  ;;  %v365_v45 = vld [vmem:[#allocation11 + $0x50] sm:$0xff]  ;;  %v366_v46 = vld [vmem:[#allocation11 + $0x58] sm:$0xff] }
  0xd2   :  { %912 = vmatprep.subr.bf16.mxu0 %v1289_v0  ;;  %v922_v44 = vpack.c.bf16 %v364_v43, %v363_v42  ;;  %v925_v47 = vpack.c.bf16 %v366_v46, %v365_v45  ;;  %v367_v48 = vld [vmem:[#allocation11 + $0x60] sm:$0xff]  ;;  %v368_v49 = vld [vmem:[#allocation11 + $0x68] sm:$0xff]  ;;  %v658_v51 = vld [vmem:[#allocation7] ss:$0 sm:$0xff] }
  0xd3   :  { %893 = vmatpush3.bf16.msra.mxu1 %v892_v14  ;;  %v928_v50 = vpack.c.bf16 %v368_v49, %v367_v48  ;;  %v369_v56 = vld [vmem:[#allocation11 + $0x70] sm:$0xff]  ;;  %v370_v57 = vld [vmem:[#allocation11 + $0x78] sm:$0xff]  ;;  %v449_v59 = vld [vmem:[#allocation14] sm:$0xff] }
  0xd4   :  { %894 = vmatprep.subr.bf16.mxu1 %v1289_v0  ;;  %v931_v58 = vpack.c.bf16 %v370_v57, %v369_v56  ;;  %v450_v60 = vld [vmem:[#allocation14 + $0x8] sm:$0xff]  ;;  %v451_v61 = vld [vmem:[#allocation14 + $0x10] sm:$0xff]  ;;  %v452_v63 = vld [vmem:[#allocation14 + $0x18] sm:$0xff] }
  0xd5   :  { %914 = vmatpush3.bf16.msra.mxu0 %v913_v35  ;;  %v934_v62 = vpack.c.bf16 %v450_v60, %v449_v59  ;;  %v937_v2 = vpack.c.bf16 %v452_v63, %v451_v61  ;;  %v453_v3 = vld [vmem:[#allocation14 + $0x20] sm:$0xff]  ;;  %v454_v4 = vld [vmem:[#allocation14 + $0x28] sm:$0xff]  ;;  %v455_v6 = vld [vmem:[#allocation14 + $0x30] sm:$0xff] }
  0xd6   :  { %915 = vmatprep.subr.bf16.mxu0 %v1289_v0  ;;  %v940_v5 = vpack.c.bf16 %v454_v4, %v453_v3  ;;  %v456_v7 = vld [vmem:[#allocation14 + $0x38] sm:$0xff]  ;;  %v457_v9 = vld [vmem:[#allocation14 + $0x40] sm:$0xff]  ;;  %v458_v10 = vld [vmem:[#allocation14 + $0x48] sm:$0xff] }
  0xd7   :  { %896 = vmatpush3.bf16.msra.mxu1 %v895_v17  ;;  %v943_v8 = vpack.c.bf16 %v456_v7, %v455_v6  ;;  %v946_v11 = vpack.c.bf16 %v458_v10, %v457_v9  ;;  %v459_v12 = vld [vmem:[#allocation14 + $0x50] sm:$0xff]  ;;  %v460_v13 = vld [vmem:[#allocation14 + $0x58] sm:$0xff]  ;;  %v461_v15 = vld [vmem:[#allocation14 + $0x60] sm:$0xff] }
  0xd8   :  { %897 = vmatprep.subr.bf16.mxu1 %v1289_v0  ;;  %v949_v14 = vpack.c.bf16 %v460_v13, %v459_v12  ;;  %v462_v16 = vld [vmem:[#allocation14 + $0x68] sm:$0xff]  ;;  %v660_v18 = vld [vmem:[#allocation10] ss:$0 sm:$0xff]  ;;  %v545_v28 = vld [vmem:[#allocation17 + $0x10] sm:$0xff] }
  0xd9   :  { %917 = vmatpush3.bf16.msra.mxu0 %v916_v38  ;;  %v952_v17 = vpack.c.bf16 %v462_v16, %v461_v15  ;;  %v464_v24 = vld [vmem:[#allocation14 + $0x78] sm:$0xff]  ;;  %v544_v27 = vld [vmem:[#allocation17 + $0x8] sm:$0xff]  ;;  %v547_v32 = vld [vmem:[#allocation17 + $0x20] sm:$0xff] }
  0xda   :  { %918 = vmatprep.subr.bf16.mxu0 %v1289_v0  ;;  %v546_v30 = vld [vmem:[#allocation17 + $0x18] sm:$0xff]  ;;  %v548_v33 = vld [vmem:[#allocation17 + $0x28] sm:$0xff]  ;;  %v551_v37 = vld [vmem:[#allocation17 + $0x40] sm:$0xff] }
  0xdb   :  { %899 = vmatpush3.bf16.msra.mxu1 %v898_v20  ;;  %v961_v31 = vpack.c.bf16 %v546_v30, %v545_v28  ;;  %v964_v34 = vpack.c.bf16 %v548_v33, %v547_v32  ;;  %v550_v35 = vld [vmem:[#allocation17 + $0x38] sm:$0xff]  ;;  %v552_v38 = vld [vmem:[#allocation17 + $0x48] sm:$0xff]  ;;  %v553_v40 = vld [vmem:[#allocation17 + $0x50] sm:$0xff] }
  0xdc   :  { %900 = vmatprep.subr.bf16.mxu1 %v1289_v0  ;;  %v970_v39 = vpack.c.bf16 %v552_v38, %v551_v37  ;;  %v555_v43 = vld [vmem:[#allocation17 + $0x60] sm:$0xff]  ;;  %v661_v46 = vld [vmem:[#allocation13] ss:$0 sm:$0xff] }
  0xdd   :  { %920 = vmatpush3.bf16.msra.mxu0 %v919_v41  ;;  %v554_v41 = vld [vmem:[#allocation17 + $0x58] sm:$0xff]  ;;  %v663_v59 = vld [vmem:[#allocation19] ss:$0 sm:$0xff] }
  0xde   :  { %921 = vmatprep.subr.bf16.mxu0 %v1289_v0  ;;  %v973_v42 = vpack.c.bf16 %v554_v41, %v553_v40 }
  0xdf   :  { %902 = vmatpush3.bf16.msra.mxu1 %v901_v23  ;;  %v463_v23 = vld [vmem:[#allocation14 + $0x70] sm:$0xff] }
  0xe0   :  { %903 = vmatprep.subr.bf16.mxu1 %v1289_v0  ;;  %v955_v25 = vpack.c.bf16 %v464_v24, %v463_v23 }
  0xe1   :  { %923 = vmatpush3.bf16.msra.mxu0 %v922_v44  ;;  %v556_v44 = vld [vmem:[#allocation17 + $0x68] sm:$0xff] }
  0xe2   :  { %924 = vmatprep.subr.bf16.mxu0 %v1289_v0  ;;  %v976_v45 = vpack.c.bf16 %v556_v44, %v555_v43 }
  0xe3   :  { %905 = vmatpush3.bf16.msra.mxu1 %v904_v26  ;;  %v543_v26 = vld [vmem:[#allocation17] sm:$0xff] }
  0xe4   :  { %906 = vmatprep.subr.bf16.mxu1 %v1289_v0 }
  0xe5   :  { %926 = vmatpush3.bf16.msra.mxu0 %v925_v47 }
  0xe6   :  { %927 = vmatprep.subr.bf16.mxu0 %v1289_v0 }
  0xe7   :  { %908 = vmatpush3.bf16.msra.mxu1 %v907_v29  ;;  %v958_v29 = vpack.c.bf16 %v544_v27, %v543_v26 }
  0xe8   :  { %933 = vmatprep.subr.bf16.mxu1 %v1289_v0 }
  0xe9   :  { %929 = vmatpush3.bf16.msra.mxu0 %v928_v50 }
  0xea   :  { %930 = vmatprep.subr.bf16.mxu0 %v1289_v0 }
  0xed   :  { %932 = vmatpush3.bf16.msra.mxu0 %v931_v58 }
  0xee   :  { %957 = vmatprep.subr.bf16.mxu0 %v1289_v0 }
 0x1a1   :  { %v256_v52 = vpop.f32.mrb[0].mxu0 }
 0x1a2   :  { %v257_v53 = vadd.f32 %v658_v51, %v256_v52  ;;  %v741_v54 = vpop.f32.mrb[1].mxu0  ;;  %v557_v51 = vld [vmem:[#allocation17 + $0x70] sm:$0xff]  ;;  %v558_v52 = vld [vmem:[#allocation17 + $0x78] sm:$0xff] }
 0x1a3   :  { %v662_v54 = vld [vmem:[#allocation16] ss:$0 sm:$0xff] }
 0x1a4   :  { %v260_v55 = vmax.f32 %v257_v53, 0.0  ;;  %v979_v53 = vpack.c.bf16 %v558_v52, %v557_v51 }
 0x1a6   :  { %775 = vmatmul.mubr.f32.vlgmr.msra.gmra.mrb[0].mxu1 %v260_v55 }
 0x1a7   :  { %844 = vmatprep.mubr.msk.f32.mxu1 %vm1290_vm0, %v1291_v1  ;;  %935 = vmatpush3.bf16.msra.mxu1 %v934_v62 }
 0x1a8   :  { %936 = vmatprep.subr.bf16.mxu1 %v1289_v0 }
 0x1ab   :  { %938 = vmatpush3.bf16.msra.mxu1 %v937_v2 }
 0x1ac   :  { %939 = vmatprep.subr.bf16.mxu1 %v1289_v0 }
 0x1af   :  { %941 = vmatpush3.bf16.msra.mxu1 %v940_v5 }
 0x1b0   :  { %942 = vmatprep.subr.bf16.mxu1 %v1289_v0 }
 0x1b3   :  { %944 = vmatpush3.bf16.msra.mxu1 %v943_v8 }
 0x1b4   :  { %945 = vmatprep.subr.bf16.mxu1 %v1289_v0 }
 0x1b7   :  { %947 = vmatpush3.bf16.msra.mxu1 %v946_v11 }
 0x1b8   :  { %948 = vmatprep.subr.bf16.mxu1 %v1289_v0 }
 0x1bb   :  { %950 = vmatpush3.bf16.msra.mxu1 %v949_v14 }
 0x1bc   :  { %951 = vmatprep.subr.bf16.mxu1 %v1289_v0 }
 0x1bf   :  { %953 = vmatpush3.bf16.msra.mxu1 %v952_v17 }
 0x1c0   :  { %954 = vmatprep.subr.bf16.mxu1 %v1289_v0 }
 0x1c3   :  { %956 = vmatpush3.bf16.msra.mxu1 %v955_v25 }
 0x279   :  { %v350_v19 = vpop.f32.mrb[0].mxu1 }
 0x27a   :  { %v351_v20 = vadd.f32 %v660_v18, %v350_v19  ;;  %v776_v21 = vpop.f32.mrb[1].mxu1 }
 0x27c   :  { %v354_v22 = vmax.f32 %v351_v20, 0.0 }
 0x27e   :  { %810 = vmatmul.mubr.f32.vlgmr.msra.gmra.mrb[2].mxu0 %v354_v22 }
 0x27f   :  { %879 = vmatprep.mubr.msk.f32.mxu0 %vm1290_vm0, %v1291_v1  ;;  %959 = vmatpush3.bf16.msra.mxu0 %v958_v29  ;;  %v549_v1 = vld [vmem:[#allocation17 + $0x30] sm:$0xff] }
 0x280   :  { %960 = vmatprep.subr.bf16.mxu0 %v1289_v0  ;;  %v967_v36 = vpack.c.bf16 %v550_v35, %v549_v1 }
 0x283   :  { %962 = vmatpush3.bf16.msra.mxu0 %v961_v31 }
 0x284   :  { %963 = vmatprep.subr.bf16.mxu0 %v1289_v0 }
 0x287   :  { %965 = vmatpush3.bf16.msra.mxu0 %v964_v34 }
 0x288   :  { %966 = vmatprep.subr.bf16.mxu0 %v1289_v0 }
 0x28b   :  { %968 = vmatpush3.bf16.msra.mxu0 %v967_v36 }
 0x28c   :  { %969 = vmatprep.subr.bf16.mxu0 %v1289_v0 }
 0x28f   :  { %971 = vmatpush3.bf16.msra.mxu0 %v970_v39 }
 0x290   :  { %972 = vmatprep.subr.bf16.mxu0 %v1289_v0 }
 0x293   :  { %974 = vmatpush3.bf16.msra.mxu0 %v973_v42 }
 0x294   :  { %975 = vmatprep.subr.bf16.mxu0 %v1289_v0 }
 0x297   :  { %977 = vmatpush3.bf16.msra.mxu0 %v976_v45 }
 0x298   :  { %978 = vmatprep.subr.bf16.mxu0 %v1289_v0 }
 0x29b   :  { %980 = vmatpush3.bf16.msra.mxu0 %v979_v53 }
 0x351   :  { %v444_v47 = vpop.f32.mrb[2].mxu0 }
 0x352   :  { %v445_v48 = vadd.f32 %v661_v46, %v444_v47  ;;  %v811_v49 = vpop.f32.mrb[3].mxu0 }
 0x354   :  { %v448_v50 = vmax.f32 %v445_v48, 0.0 }
 0x356   :  { %845 = vmatmul.mubr.f32.vlgmr.msra.gmra.mrb[2].mxu1 %v448_v50 }
 0x429   :  { %v538_v55 = vpop.f32.mrb[2].mxu1 }
 0x42a   :  { %v539_v56 = vadd.f32 %v662_v54, %v538_v55  ;;  %v846_v57 = vpop.f32.mrb[3].mxu1 }
 0x42c   :  { %v542_v58 = vmax.f32 %v539_v56, 0.0 }
 0x42e   :  { %880 = vmatmul.mubr.f32.vlgmr.msra.gmra.mrb[4].mxu0 %v542_v58 }
 0x501   :  { %v632_v0 = vpop.f32.mrb[4].mxu0 }
 0x502   :  { %v633_v60 = vadd.f32 %v663_v59, %v632_v0  ;;  %v881_v61 = vpop.f32.mrb[5].mxu0 }
 0x504   :  { %637 = vst.msk [vmem:[#allocation20] sm:$0xff] %vm636_vm2, %v633_v60 }
 0x505   :  { %1251 = shalt.err (!%p1248_p8)
}
 0x506   :  { %s1252_s23 = scalar_lea.hbm %s1566_s11, 128 }
 0x507   :  { %p1253_p9 = scmp.ne.s32.totalorder %s1566_s11, %s1252_s23  ;;  %p1256_p10 = scmp.lt.u32.totalorder %s1252_s23, %s1566_s11 }
 0x509   :  { %p1258_p11 = pnand %p1256_p10, %p1253_p9 }
 0x50b   :  { %1261 = shalt.err (!%p1258_p11)
}
 0x50c   :  { %647 = dma.vmem_to_hbm [thread:$0]  %s645_s7, 128, %s1566_s11, [#allocation4]  }
 0x50d   :  { %1274 = dma.done.wait [#allocation4], 128  }
 0x50e   :  { %1275 = vsyncadd [#allocation4], 4294967168 }
 0x50f   :  { %651 = vsyncpa [#allocation3], 1 }
 0x510   :  { %652 = vsyncpa [#allocation6], 1 }
 0x511   :  { %653 = vsyncpa [#allocation9], 1 }
 0x512   :  { %654 = vsyncpa [#allocation12], 1 }
 0x513   :  { %655 = vsyncpa [#allocation15], 1 }
 0x514   :  { %656 = vsyncpa [#allocation18], 1 }
 0x515   :  { %657 = vsyncpa [#allocation4], 1 }

</bundles_post_ra>
